<compile_context>
chip_gen: v7x
topology: tpu7x:2x2x1
jax: 0.10.0
libtpu: 0.0.40
codegen_flags: <defaults>
</compile_context>

<pallas_src>
import jax
import jax.numpy as jnp
from jax.experimental import pallas as pl
from jax.experimental.pallas import tpu as pltpu

N_CLASSES = 3                       # settings.n_classes (both convs share the input)
C_IN = N_CLASSES + 1                # = 4
MAX_TP = 65536                      # max pixels (lane dim) per grid step
TARGET_PX = 65536                   # target pixels per step when batch-packing
VMEM_LIMIT_BYTES = 48 * 1024 * 1024 # safe on v7x (64 MiB physical), fine on v5e/v6e


def _round_up(x, m):
    return ((x + m - 1) // m) * m


def _make_kernel(b_tile, n_layers, hw, tp, needs_mask):
    """Kernel factory: static shapes baked in via closure."""

    def kernel(x_ref, w_ref, b_ref, clf_ref, reg_ref):
        # x_ref:   (b_tile, C_IN, tp)   channels on sublanes, pixels on lanes
        # w_ref:   (2*n_layers, C_IN)   fused [classifier | detector] weights
        # b_ref:   (2*n_layers, 1)      fused biases
        # clf_ref: (b_tile, n_layers, tp)   softmax output tile
        # reg_ref: (b_tile, n_layers, tp)   tanh output tile
        w = w_ref[...]
        bias = b_ref[...]

        if needs_mask:
            # Ragged last pixel tile: zero out-of-range lanes so exp/tanh never
            # see uninitialized data (their stores are masked by Pallas anyway).
            col = pl.program_id(1) * tp + jax.lax.broadcasted_iota(
                jnp.int32, (1, tp), 1)
            valid = col < hw

        for i in range(b_tile):                       # static unroll over packed images
            x = x_ref[i].astype(jnp.float32)          # (C_IN, tp)
            if needs_mask:
                x = jnp.where(valid, x, 0.0)

            # 1x1 conv == per-pixel channel contraction on the MXU (vex slot);
            # VPU stays free for the softmax/tanh epilogue.
            z = jnp.dot(w, x, preferred_element_type=jnp.float32) + bias  # (2L, tp)

            clf_logits = z[:n_layers, :]              # (n_layers, tp) — sublane-aligned
            reg_logits = z[n_layers:, :]

            # Channel softmax: reduction over the sublane rows (dense vregs).
            m = jnp.max(clf_logits, axis=0, keepdims=True)     # (1, tp)
            e = jnp.exp(clf_logits - m)
            s = jnp.sum(e, axis=0, keepdims=True)               # (1, tp)
            clf_ref[i] = (e / s).astype(clf_ref.dtype)          # exact softmax
            reg_ref[i] = jnp.tanh(reg_logits).astype(reg_ref.dtype)

    return kernel


def detection_layer(x_nchw, wc, bc, wd, bd):
    """x_nchw: [N, C_IN, H, W]; wc/wd: [C_IN, n_layers]; bc/bd: [n_layers].

    Returns {'clf': [N, n_layers, H, W], 'reg': [N, n_layers, H, W]}.
    """
    n, c, h, w_sp = x_nchw.shape
    assert c == C_IN, "DetectionLayer requires n_classes + 1 == 4 input channels"
    n_layers = wc.shape[1]
    assert wc.shape == (C_IN, n_layers) and wd.shape == (C_IN, n_layers)
    c_out = 2 * n_layers
    hw = h * w_sp

    # Native-layout flatten (free reshape, no transpose): [N, C, H*W].
    x3 = x_nchw.reshape(n, c, hw)

    # ---- pixel tile selection (no host pad, no output slice) -------------
    hw128 = _round_up(hw, 128)
    n_ptiles = 1 if hw128 <= MAX_TP else pl.cdiv(hw128, MAX_TP)
    # Guarantee >= 2 grid steps when possible so both v7x TensorCores get work.
    if n * n_ptiles < 2 and hw >= 256:
        n_ptiles = 2
    if n_ptiles == 1:
        tp = hw                                  # full dim: no ragged tail at all
    else:
        tp = _round_up(pl.cdiv(hw, n_ptiles), 128)   # 128-multiple lane tile
        n_ptiles = pl.cdiv(hw, tp)
    needs_mask = (hw % tp) != 0                  # ragged last pixel tile?

    # ---- batch packing for small feature maps ----------------------------
    b_tile = 1
    if n_ptiles == 1:
        for b in range(1, n + 1):
            if n % b:                            # keep batch blocks uniform
                continue
            if b * hw128 > TARGET_PX:            # cap pixels (and VMEM) per step
                continue
            if n >= 2 and (n // b) < 2:          # keep >= 2 steps for dual-TC
                continue
            b_tile = b
    grid = (n // b_tile, n_ptiles)

    # Fuse the two branches' parameters into one resident weight/bias block.
    w_cat = jnp.concatenate([wc, wd], axis=1).T.astype(jnp.float32)          # (c_out, C_IN)
    b_cat = jnp.concatenate([bc, bd]).reshape(c_out, 1).astype(jnp.float32)  # (c_out, 1)

    out_dtype = x_nchw.dtype
    m_total = n * hw
    in_b = jnp.dtype(x_nchw.dtype).itemsize
    out_b = jnp.dtype(out_dtype).itemsize
    cost = pl.CostEstimate(
        flops=2 * m_total * C_IN * c_out,
        transcendentals=m_total * 2 * n_layers,                 # exp + tanh
        bytes_accessed=m_total * (C_IN * in_b + 2 * n_layers * out_b),
    )

    kernel = _make_kernel(b_tile, n_layers, hw, tp, needs_mask)

    clf3, reg3 = pl.pallas_call(
        kernel,
        out_shape=(
            jax.ShapeDtypeStruct((n, n_layers, hw), out_dtype),
            jax.ShapeDtypeStruct((n, n_layers, hw), out_dtype),
        ),
        grid_spec=pltpu.PrefetchScalarGridSpec(
            num_scalar_prefetch=0,
            grid=grid,
            in_specs=[
                pl.BlockSpec((b_tile, C_IN, tp), lambda bi, pi: (bi, 0, pi)),  # x tile
                pl.BlockSpec((c_out, C_IN), lambda bi, pi: (0, 0)),            # fused weights
                pl.BlockSpec((c_out, 1), lambda bi, pi: (0, 0)),               # fused biases
            ],
            out_specs=[
                pl.BlockSpec((b_tile, n_layers, tp), lambda bi, pi: (bi, 0, pi)),
                pl.BlockSpec((b_tile, n_layers, tp), lambda bi, pi: (bi, 0, pi)),
            ],
        ),
        compiler_params=pltpu.CompilerParams(
            dimension_semantics=("parallel", "parallel"),
            vmem_limit_bytes=VMEM_LIMIT_BYTES,
        ),
        cost_estimate=cost,
    )(x3, w_cat, b_cat)

    clf = clf3.reshape(n, n_layers, h, w_sp)
    reg = reg3.reshape(n, n_layers, h, w_sp)
    return {'clf': clf, 'reg': reg}


def _reference(x_nchw, wc, bc, wd, bd):
    # Plain-JAX reference of the PyTorch forward (NCHW 1x1 conv == channel matmul).
    x = jnp.transpose(x_nchw, (0, 2, 3, 1)).astype(jnp.float32)   # NHWC
    hi = jax.lax.Precision.HIGHEST
    logits = jnp.einsum('nhwc,ck->nhwk', x, wc, precision=hi) + bc
    clf = jax.nn.softmax(logits, axis=-1)
    reg = jnp.tanh(jnp.einsum('nhwc,ck->nhwk', x, wd, precision=hi) + bd)
    return {'clf': jnp.transpose(clf, (0, 3, 1, 2)),
            'reg': jnp.transpose(reg, (0, 3, 1, 2))}


if __name__ == "__main__":
    key = jax.random.PRNGKey(0)
    k_x, k_wc, k_bc, k_wd, k_bd = jax.random.split(key, 5)

    N_LAYERS = 8
    bound = 1.0 / (C_IN ** 0.5)
    wc = jax.random.uniform(k_wc, (C_IN, N_LAYERS), minval=-bound, maxval=bound)
    bc = jax.random.uniform(k_bc, (N_LAYERS,), minval=-bound, maxval=bound)
    wd = jax.random.uniform(k_wd, (C_IN, N_LAYERS), minval=-bound, maxval=bound)
    bd = jax.random.uniform(k_bd, (N_LAYERS,), minval=-bound, maxval=bound)

    # Cover the three tiling regimes:
    #   (2,4,16,16): primary case, grid (2,1), one full-image tile per step
    #   (1,4,15,20): single image -> split into 2 ragged pixel tiles (tail mask)
    #   (4,4, 8, 8): tiny maps -> batch packing (2 images per grid step)
    test_shapes = [(2, C_IN, 16, 16), (1, C_IN, 15, 20), (4, C_IN, 8, 8)]

    for i, shape in enumerate(test_shapes):
        x = jax.random.normal(jax.random.fold_in(k_x, i), shape, dtype=jnp.float32)
        out = detection_layer(x, wc, bc, wd, bd)
        jax.block_until_ready(out)
        ref = _reference(x, wc, bc, wd, bd)
        n, _, hh, ww = shape
        assert out['clf'].shape == (n, N_LAYERS, hh, ww)
        assert out['reg'].shape == (n, N_LAYERS, hh, ww)
        assert jnp.allclose(out['clf'], ref['clf'], atol=2e-3), f"clf mismatch {shape}"
        assert jnp.allclose(out['reg'], ref['reg'], atol=1e-3, rtol=1e-3), f"reg mismatch {shape}"

    print("KERNEL_OK")
</pallas_src>

<mosaic_0001>
module attributes {stable_mosaic.version = 11 : i64} {
  func.func @kernel(%arg0: i32, %arg1: i32, %arg2: memref<1x4x256xf32, #tpu.memory_space<vmem>>, %arg3: memref<16x4xf32, #tpu.memory_space<vmem>>, %arg4: memref<16x1xf32, #tpu.memory_space<vmem>>, %arg5: memref<1x8x256xf32, #tpu.memory_space<vmem>>, %arg6: memref<1x8x256xf32, #tpu.memory_space<vmem>>) attributes {dimension_semantics = [#tpu.dimension_semantics<parallel>, #tpu.dimension_semantics<parallel>], iteration_bounds = array<i64: 2, 1>, scalar_prefetch = 0 : i64, scratch_operands = 0 : i64, tpu.core_type = #tpu.core_type<tc>, window_params = [{transform_indices = @transform_0, window_bounds = array<i64: 1, 4, 256>}, {pipeline_mode = #tpu.pipeline_mode<synchronous>, transform_indices = @transform_1, window_bounds = array<i64: 16, 4>}, {pipeline_mode = #tpu.pipeline_mode<synchronous>, transform_indices = @transform_2, window_bounds = array<i64: 16, 1>}, {transform_indices = @transform_3, window_bounds = array<i64: 1, 8, 256>}, {transform_indices = @transform_4, window_bounds = array<i64: 1, 8, 256>}]} {
    %c0 = arith.constant 0 : index
    %c0_0 = arith.constant 0 : index
    %0 = vector.load %arg3[%c0, %c0_0] : memref<16x4xf32, #tpu.memory_space<vmem>>, vector<16x4xf32>
    %c0_1 = arith.constant 0 : index
    %c0_2 = arith.constant 0 : index
    %1 = vector.load %arg4[%c0_1, %c0_2] : memref<16x1xf32, #tpu.memory_space<vmem>>, vector<16x1xf32>
    %c0_3 = arith.constant 0 : index
    %c0_4 = arith.constant 0 : index
    %c0_5 = arith.constant 0 : index
    %2 = vector.load %arg2[%c0_3, %c0_4, %c0_5] : memref<1x4x256xf32, #tpu.memory_space<vmem>>, vector<1x4x256xf32>
    %3 = vector.shape_cast %2 : vector<1x4x256xf32> to vector<4x256xf32>
    %cst = arith.constant dense<0.000000e+00> : vector<16x256xf32>
    %4 = tpu.matmul %0, %3, %cst {dimension_numbers = #tpu.dot_dimension_numbers<[1], [0], [0], [1], [0, 0, 1, 1], [], []>} : vector<16x4xf32>, vector<4x256xf32>, vector<16x256xf32> -> vector<16x256xf32>
    %5 = vector.broadcast %1 : vector<16x1xf32> to vector<16x256xf32>
    %6 = arith.addf %4, %5 : vector<16x256xf32>
    %7 = vector.extract_strided_slice %6 {offsets = [0, 0], sizes = [8, 256], strides = [1, 1]} : vector<16x256xf32> to vector<8x256xf32>
    %8 = vector.extract_strided_slice %6 {offsets = [8, 0], sizes = [8, 256], strides = [1, 1]} : vector<16x256xf32> to vector<8x256xf32>
    %cst_6 = arith.constant dense<0xFF800000> : vector<256xf32>
    %9 = vector.multi_reduction <maximumf>, %7, %cst_6 [0] : vector<8x256xf32> to vector<256xf32>
    %10 = vector.shape_cast %9 : vector<256xf32> to vector<1x256xf32>
    %11 = vector.broadcast %10 : vector<1x256xf32> to vector<8x256xf32>
    %12 = arith.subf %7, %11 : vector<8x256xf32>
    %13 = math.exp %12 : vector<8x256xf32>
    %cst_7 = arith.constant dense<0.000000e+00> : vector<256xf32>
    %14 = vector.multi_reduction <add>, %13, %cst_7 [0] : vector<8x256xf32> to vector<256xf32>
    %15 = vector.shape_cast %14 : vector<256xf32> to vector<1x256xf32>
    %16 = vector.broadcast %15 : vector<1x256xf32> to vector<8x256xf32>
    %17 = arith.divf %13, %16 : vector<8x256xf32>
    %c0_8 = arith.constant 0 : index
    %c0_9 = arith.constant 0 : index
    %c0_10 = arith.constant 0 : index
    %18 = vector.load %arg5[%c0_8, %c0_9, %c0_10] : memref<1x8x256xf32, #tpu.memory_space<vmem>>, vector<1x8x256xf32>
    %19 = vector.shape_cast %18 : vector<1x8x256xf32> to vector<8x256xf32>
    %20 = vector.shape_cast %17 : vector<8x256xf32> to vector<1x8x256xf32>
    tpu.vector_store %arg5[%c0_8, %c0_9, %c0_10], %20 {strides = array<i32>} : memref<1x8x256xf32, #tpu.memory_space<vmem>>, vector<1x8x256xf32>,
    %21 = math.tanh %8 : vector<8x256xf32>
    %c0_11 = arith.constant 0 : index
    %c0_12 = arith.constant 0 : index
    %c0_13 = arith.constant 0 : index
    %22 = vector.load %arg6[%c0_11, %c0_12, %c0_13] : memref<1x8x256xf32, #tpu.memory_space<vmem>>, vector<1x8x256xf32>
    %23 = vector.shape_cast %22 : vector<1x8x256xf32> to vector<8x256xf32>
    %24 = vector.shape_cast %21 : vector<8x256xf32> to vector<1x8x256xf32>
    tpu.vector_store %arg6[%c0_11, %c0_12, %c0_13], %24 {strides = array<i32>} : memref<1x8x256xf32, #tpu.memory_space<vmem>>, vector<1x8x256xf32>,
    return
  }
  func.func @transform_0(%arg0: i32, %arg1: i32) -> (i32, i32, i32) {
    %c0_i32 = arith.constant 0 : i32
    %c0_i32_0 = arith.constant 0 : i32
    return %arg0, %c0_i32, %arg1 : i32, i32, i32
  }
  func.func @transform_1(%arg0: i32, %arg1: i32) -> (i32, i32) {
    %c0_i32 = arith.constant 0 : i32
    %c0_i32_0 = arith.constant 0 : i32
    %c0_i32_1 = arith.constant 0 : i32
    return %c0_i32, %c0_i32_0 : i32, i32
  }
  func.func @transform_2(%arg0: i32, %arg1: i32) -> (i32, i32) {
    %c0_i32 = arith.constant 0 : i32
    %c0_i32_0 = arith.constant 0 : i32
    %c0_i32_1 = arith.constant 0 : i32
    return %c0_i32, %c0_i32_0 : i32, i32
  }
  func.func @transform_3(%arg0: i32, %arg1: i32) -> (i32, i32, i32) {
    %c0_i32 = arith.constant 0 : i32
    %c0_i32_0 = arith.constant 0 : i32
    return %arg0, %c0_i32, %arg1 : i32, i32, i32
  }
  func.func @transform_4(%arg0: i32, %arg1: i32) -> (i32, i32, i32) {
    %c0_i32 = arith.constant 0 : i32
    %c0_i32_0 = arith.constant 0 : i32
    return %arg0, %c0_i32, %arg1 : i32, i32, i32
  }
}

</mosaic_0001>

<bundles_post_ra>
// kernel: tpu_custom_call.1
= control target key start
LH: loop header
LB: loop body
LE: loop exit
PB: predicated region body
PF: predicated region fallthrough
CT: control target
= control target key end

     0   :  { %10 = vsyncpa [#allocation3], 0  ;;  %s944_s0 = inlined_call_operand.vmem [shape: f32[2,4,256], index: 0, kind: input, shape index: {}]   ;;  %s945_s1 = inlined_call_operand.vmem [shape: f32[16,4], index: 1, kind: input, shape index: {}]   ;;  %s946_s2 = inlined_call_operand.vmem [shape: f32[16,1], index: 2, kind: input, shape index: {}]   ;;  %s947_s3 = inlined_call_operand.hbm [shape: f32[2,8,256], index: 3, kind: output, shape index: {0}]   ;;  %s948_s4 = inlined_call_operand.hbm [shape: f32[2,8,256], index: 4, kind: output, shape index: {1}]  }
   0x1   :  { %12 = vsyncpa [#allocation3 + $0x1], 0 }
   0x2   :  { %13 = vsyncpa [#allocation5], 0 }
   0x3   :  { %15 = vsyncpa [#allocation5 + $0x1], 0  ;;  %s779_s15 = smov 0   ;;  %s781_s16 = smov 0  }
   0x4   :  { %s783_s17 = smov 0   ;;  %s785_s18 = smov 0  }
   0x5   :  { %s787_s19 = smov 0   ;;  %s789_s20 = smov 0  }
   0x6 LB: > { %s536_s21 = sadd.s32 4294967295, %s748_s20   ;;  %s537_s22 = sadd.s32 4294967294, %s748_s20   ;;  %s748_s20 = sphi %s789_s20, %s21_s20   ;;  %s744_s19 = sphi %s787_s19, %s955_s19   ;;  %s740_s18 = sphi %s785_s18, %s954_s18   ;;  %s736_s17 = sphi %s783_s17, %s953_s17   ;;  %s732_s16 = sphi %s781_s16, %s952_s16   ;;  %s728_s15 = sphi %s779_s15, %s951_s15  }
   0x7   : > { %s33_s23 = sadd.s32 1, %s744_s19  ;;  %s112_s24 = sadd.s32 1, %s736_s17 }
   0x8   : > { %p35_p0 = scmp.ge.s32.totalorder %s33_s23, 2  ;;  %p122_p1 = scmp.ne.s32.totalorder %s736_s17, %s732_s16 }
   0x9   : > { %p123_p2 = scmp.eq.s32.totalorder %s536_s21, 1  ;;  %p128_p3 = scmp.ne.s32.totalorder %s732_s16, %s728_s15 }
   0xa   : > { %s957_s23 = smov (%p35_p0, %s33_s23), 0  ;;  %p129_p5 = scmp.eq.s32.totalorder %s537_s22, 1 }
   0xb   : > { %p819_p4 = por %p123_p2, %p122_p1  ;;  %s107_s26 = ssub.s32 %s744_s19, %s957_s23 }
   0xc   : > { %p540_p6 = scmp.ge.s32.totalorder %s748_s20, 1  ;;  %p110_p7 = scmp.eq.s32.totalorder %s107_s26, 0 }
   0xd   : > { %p826_p8 = por %p129_p5, %p128_p3  ;;  %p194_p9 = scmp.lt.s32.totalorder %s748_s20, 3 }
   0xe   : > { %s832_s28 = scalar_select %p110_p7, %s736_s17, %s112_s24  }
   0xf   : > { %p195_p10 = pnand %p540_p6, %p194_p9 }
  0x10   : > { %p230_p11 = scmp.lt.s32.totalorder (!%p195_p10), %s740_s18, 1  ;;  %v750_v0 = vmov (!%p195_p10), 0.0   ;;  %v243_v1 = vld [vmem:[%s946_s2] sm:$0xff] (!%p195_p10)  ;;  %v751_v2 = vmov (!%p195_p10), 0   ;;  %v244_v3 = vld [vmem:[%s946_s2 + $0x8] sm:$0xff] (!%p195_p10)  ;;  %vm265_vm0 = vcmask (!%p195_p10), 1043456  }
  0x11   : > { %198 = sbr.rel (%p195_p10) target bundleno = 326 (0x146), region = 32  ;;  %334 = vmatprep.mubr.f32.mxu0 (!%p195_p10), %v750_v0  ;;  %340 = vmatprep.mubr.f32.mxu1 (!%p195_p10), %v750_v0  ;;  %v241_v6 = vld [vmem:[%s945_s1] sm:$0xff] (!%p195_p10)  ;;  %vm258_vm1 = vcmask (!%p195_p10), 31744   ;;  %v242_v7 = vld [vmem:[%s945_s1 + $0x8] sm:$0xff] (!%p195_p10)  ;;  %s852_s22 = sand.u32 (!%p195_p10), 1, %s732_s16  }
  0x12   : > { %624 = vset.pattern.permute.xlu0 (!%p195_p10), %v751_v2  ;;  %s541_s24 = sshll.u32 (!%p195_p10), %s852_s22, 4  ;;  %s558_s26 = sshll.u32 (!%p195_p10), %s740_s18, 8 }
  0x13   : > { %248 = vperm.xlu0 (!%p195_p10), %624, %v243_v1   ;;  %s228_s29 = scalar_lea.vmem (!%p195_p10), [#allocation4], %s541_s24  ;;  %s863_s7 = scalar_lea.hbm (!%p195_p10), %s948_s4, %s558_s26 }
  0x14   : > { %s425_s30 = sshll.u32 (!%p195_p10), %s228_s29, 4  ;;  %s393_s8 = scalar_lea.sflag (!%p195_p10), [#allocation5], %s852_s22  ;;  %s865_s30 = int_to_ptr.vmem [resolvable:$true] %s425_s30 }
  0x15   : > { %s638_s9 = scalar_lea.vmem (!%p195_p10), %s865_s30, 256  ;;  %s752_s10 = smov (!%p195_p10), [#allocation4]  }
  0x16   : > { %p639_p12 = scmp.ne.s32.totalorder (!%p195_p10), %s865_s30, %s638_s9 }
  0x17   : > { %253 = vperm.xlu0 (!%p195_p10), %624, %v244_v3  }
  0x18   : > { %s231_s5 = scalar_select %p230_p11, %s740_s18, 1 }
  0x19   : > { %p640_p13 = pnand %p639_p12, %p819_p4 }
  0x1a   : > { %s557_s6 = sshll.u32 %s231_s5, 3 }
  0x1b   : > { %s237_s11 = scalar_lea.vmem %s944_s0, %s557_s6  ;;  %p641_p0 = pneg %p640_p13 }
  0x1c   : > { %v245_v4 = vld [vmem:[%s237_s11] sm:$0xff]  ;;  %s642_s11 = sshll.u32 %s752_s10, 4  ;;  %s643_s11 = int_to_ptr.vmem [resolvable:$false] %s642_s11 }
  0x1d   : > { %v257_v5 = vcombine.high %v245_v4, %v245_v4  ;;  %s644_s12 = scalar_lea.vmem %s643_s11, 512  ;;  %p645_p1 = scmp.lt.s32.totalorder %s865_s30, %s643_s11 }
  0x1e   : > { %p646_p2 = scmp.lt.s32.totalorder %s644_s12, %s638_s9 }
  0x1f   : > { %545 = vmatprep.subr.msk.mxu0 %vm265_vm0, %v257_v5  ;;  %560 = vmatprep.subr.msk.mxu1 %vm265_vm0, %v257_v5 }
  0x20   : > { %546 = vmatpush1.msk.msra.mxu0 %vm265_vm0, %v245_v4  ;;  %561 = vmatpush1.msk.msra.mxu1 %vm265_vm0, %v245_v4  ;;  %p647_p3 = por %p646_p2, %p645_p1 }
  0x21   : > { %547 = vmatmul.mubr.msk.f32.vlgmr.msra.gmra.mrb[0].mxu0 %vm258_vm1, %v241_v6  ;;  %548 = vmatmul.mubr.msk.f32.vlgmr.msra.gmra.mrb[0].mxu1 %vm258_vm1, %v242_v7 }
  0x22   : > { %p648_p5 = pnand %p647_p3, %p641_p0 }
  0x92   : > { %v249_v8 = vpop.permute.xlu0 %248 }
  0x96   : > { %v254_v9 = vpop.permute.xlu0 %253 }
  0xf4   : > { %v336_v10 = vpop.f32.mrb[0].mxu0  ;;  %v342_v11 = vpop.f32.mrb[0].mxu1 }
  0xf5   : > { %v337_v12 = vadd.f32 %v336_v10, %v249_v8  ;;  %v343_v13 = vadd.f32 %v342_v11, %v254_v9  ;;  %v338_v14 = vpop.f32.mrb[1].mxu0  ;;  %v344_v15 = vpop.f32.mrb[1].mxu1 }
  0xf6   : > { %v339_v16 = vadd.f32 %v338_v14, %v249_v8  ;;  %v345_v17 = vadd.f32 %v344_v15, %v254_v9 }
  0xf7   : > { %v347_v18 = vrot.slane %v337_v12, 4  ;;  %626 = vtanh.f32 %v343_v13 }
  0xf8   : > { %v353_v19 = vrot.slane %v339_v16, 4  ;;  %628 = vtanh.f32 %v345_v17 }
  0xf9   : > { %v348_v20 = vmax.f32 %v337_v12, %v347_v18 }
  0xfa   : > { %v354_v21 = vmax.f32 %v339_v16, %v353_v19 }
  0xfb   : > { %v349_v22 = vrot.slane %v348_v20, 2 }
  0xfc   : > { %v355_v23 = vrot.slane %v354_v21, 2 }
  0xfd   : > { %v350_v24 = vmax.f32 %v348_v20, %v349_v22 }
  0xfe   : > { %v356_v25 = vmax.f32 %v354_v21, %v355_v23 }
  0xff   : > { %v351_v26 = vrot.slane %v350_v24, 1 }
 0x100   : > { %v357_v27 = vrot.slane %v356_v25, 1 }
 0x101   : > { %v627_v28 = vpop.eup %626  ;;  %v352_v29 = vmax.f32 %v350_v24, %v351_v26 }
 0x102   : > { %v629_v30 = vpop.eup %628  ;;  %v358_v31 = vmax.f32 %v356_v25, %v357_v27  ;;  %385 = vst [vmem:[%s228_s29] sm:$0xff] %v627_v28 }
 0x103   : > { %v359_v32 = vsub.f32 %v337_v12, %v352_v29  ;;  %386 = vst [vmem:[%s228_s29 + $0x8] sm:$0xff] %v629_v30 }
 0x104   : > { %v360_v33 = vsub.f32 %v339_v16, %v358_v31 }
 0x105   : > { %651 = shalt.err (!%p648_p5)
}
 0x106   : > { %s652_s13 = scalar_lea.hbm %s863_s7, 256  ;;  %s656_s29 = scalar_lea.hbm %s948_s4, 512 }
 0x107   : > { %p653_p6 = scmp.ne.s32.totalorder %s863_s7, %s652_s13  ;;  %p657_p10 = scmp.lt.u32.totalorder %s863_s7, %s948_s4 }
 0x108   : > { %p658_p11 = scmp.lt.u32.totalorder %s656_s29, %s652_s13  ;;  %p660_p13 = scmp.lt.u32.totalorder %s652_s13, %s863_s7 }
 0x109   : > { %p654_p7 = pnand %p653_p6, %p819_p4 }
 0x10a   : > { %p659_p12 = por %p658_p11, %p657_p10 }
 0x10b   : > { %p655_p9 = pneg %p654_p7 }
 0x10c   : > { %p661_p0 = por %p660_p13, %p659_p12 }
 0x10e   : > { %p662_p1 = pnand %p661_p0, %p655_p9 }
 0x110   : > { %665 = shalt.err (!%p662_p1)
}
 0x111   : > { %563 = dma.vmem_to_hbm [thread:$0]  (%p819_p4), %s865_s30, 256, %s863_s7, %s393_s8   ;;  %v361_v34 = vmul.f32 1.442695, %v359_v32  ;;  %v363_v35 = vmul.f32 1.442695, %v360_v33 }
 0x112   : > { %s221_s30 = scalar_lea.vmem [#allocation2], %s541_s24  ;;  %s896_s10 = scalar_lea.hbm %s947_s3, %s558_s26 }
 0x113   : > { %630 = vpow2.f32 %v361_v34  ;;  %s409_s7 = sshll.u32 %s221_s30, 4  ;;  %s388_s11 = scalar_lea.sflag [#allocation3], %s852_s22  ;;  %s898_s7 = int_to_ptr.vmem [resolvable:$true] %s409_s7 }
 0x114   : > { %632 = vpow2.f32 %v363_v35  ;;  %s666_s24 = scalar_lea.vmem %s898_s7, 256  ;;  %s753_s12 = smov [#allocation2]  }
 0x115   : > { %p667_p2 = scmp.ne.s32.totalorder %s898_s7, %s666_s24  ;;  %s670_s18 = sshll.u32 %s753_s12, 4  ;;  %s671_s18 = int_to_ptr.vmem [resolvable:$false] %s670_s18 }
 0x116   : > { %s672_s13 = scalar_lea.vmem %s671_s18, 512  ;;  %p673_p6 = scmp.lt.s32.totalorder %s898_s7, %s671_s18 }
 0x117   : > { %p668_p3 = pnand %p667_p2, %p819_p4  ;;  %p674_p7 = scmp.lt.s32.totalorder %s672_s13, %s666_s24 }
 0x119   : > { %p669_p5 = pneg %p668_p3  ;;  %p675_p9 = por %p674_p7, %p673_p6 }
 0x11b   : > { %p676_p10 = pnand %p675_p9, %p669_p5 }
 0x11d   : > { %v631_v36 = vpop.eup %630 }
 0x11e   : > { %v633_v37 = vpop.eup %632  ;;  %v365_v38 = vrot.slane %v631_v36, 4 }
 0x11f   : > { %v371_v39 = vrot.slane %v633_v37, 4 }
 0x120   : > { %v366_v40 = vadd.f32 %v631_v36, %v365_v38 }
 0x121   : > { %v372_v41 = vadd.f32 %v633_v37, %v371_v39 }
 0x122   : > { %v367_v42 = vrot.slane %v366_v40, 2 }
 0x123   : > { %v373_v43 = vrot.slane %v372_v41, 2 }
 0x124   : > { %v368_v44 = vadd.f32 %v367_v42, %v366_v40 }
 0x125   : > { %v374_v45 = vadd.f32 %v373_v43, %v372_v41 }
 0x126   : > { %v369_v46 = vrot.slane %v368_v44, 1 }
 0x127   : > { %v375_v47 = vrot.slane %v374_v45, 1 }
 0x128   : > { %v370_v48 = vadd.f32 %v369_v46, %v368_v44 }
 0x129   : > { %v376_v49 = vadd.f32 %v375_v47, %v374_v45 }
 0x12a   : > { %634 = vrcp.f32 %v370_v48 }
 0x12b   : > { %636 = vrcp.f32 %v376_v49 }
 0x134   : > { %v635_v50 = vpop.eup %634 }
 0x135   : > { %v637_v51 = vpop.eup %636  ;;  %v378_v52 = vmul.f32 %v635_v50, %v631_v36 }
 0x136   : > { %v380_v53 = vmul.f32 %v637_v51, %v633_v37 }
 0x137   : > { %381 = vst [vmem:[%s221_s30] sm:$0xff] %v378_v52 }
 0x138   : > { %382 = vst [vmem:[%s221_s30 + $0x8] sm:$0xff] %v380_v53 }
 0x139   : > { %679 = shalt.err (!%p676_p10)
}
 0x13a   : > { %s680_s22 = scalar_lea.hbm %s896_s10, 256  ;;  %s684_s21 = scalar_lea.hbm %s947_s3, 512 }
 0x13b   : > { %p681_p11 = scmp.ne.s32.totalorder %s896_s10, %s680_s22  ;;  %p685_p0 = scmp.lt.u32.totalorder %s896_s10, %s947_s3 }
 0x13c   : > { %p686_p1 = scmp.lt.u32.totalorder %s684_s21, %s680_s22  ;;  %p688_p3 = scmp.lt.u32.totalorder %s680_s22, %s896_s10 }
 0x13d   : > { %p682_p12 = pnand %p681_p11, %p819_p4 }
 0x13e   : > { %p687_p2 = por %p686_p1, %p685_p0 }
 0x13f   : > { %p683_p13 = pneg %p682_p12 }
 0x140   : > { %p689_p5 = por %p688_p3, %p687_p2 }
 0x142   : > { %p690_p6 = pnand %p689_p5, %p683_p13 }
 0x144   : > { %693 = shalt.err (!%p690_p6)
}
 0x145   : > { %562 = dma.vmem_to_hbm [thread:$0]  (%p819_p4), %s898_s7, 256, %s896_s10, %s388_s11  }
 0x146 PF: > { %p573_p7 = scmp.ge.s32.totalorder %s748_s20, 2  ;;  %s437_s6 = sand.u32 1, %s728_s15  }
 0x147   : > { %s438_s30 = scalar_lea.sflag [#allocation3], %s437_s6 }
 0x148   : > { %p567_p9 = pnand %p573_p7, %p826_p8 }
 0x14a   : > { %719 = dma.done.wait (!%p567_p9), %s438_s30, 256  }
 0x14b   : > { %721 = vsyncadd (!%p567_p9), %s438_s30, 4294967040  ;;  %s447_s8 = scalar_lea.sflag [#allocation5], %s437_s6 }
 0x14c   : > { %723 = dma.done.wait (!%p567_p9), %s447_s8, 256  }
 0x14d   : > { %725 = vsyncadd (!%p567_p9), %s447_s8, 4294967040  ;;  %s21_s20 = sadd.s32 1, %s748_s20   ;;  %s951_s15 = smov %s732_s16 }
 0x14e   : > { %p18_p10 = scmp.ge.s32.totalorder %s21_s20, 4   ;;  %s952_s16 = smov %s736_s17 }
 0x14f   : > { %s953_s17 = smov %s832_s28  ;;  %s954_s18 = smov %s744_s19 }
 0x150   : > { %s955_s19 = smov %s957_s23  ;;  %20 = sbr.rel (!%p18_p10) target bundleno = 6 (0x6), region = 84 }
 0x157   :  { %452 = vsyncpa [#allocation3], 1 }
 0x158   :  { %454 = vsyncpa [#allocation3 + $0x1], 1 }
 0x159   :  { %455 = vsyncpa [#allocation5], 1 }
 0x15a   :  { %457 = vsyncpa [#allocation5 + $0x1], 1 }

</bundles_post_ra>
